<compile_context>
chip_gen: v7x
topology: tpu7x:2x2x1
jax: 0.10.0
libtpu: 0.0.40
codegen_flags: <defaults>
</compile_context>

<pallas_src>
import jax
import jax.numpy as jnp
from jax.experimental import pallas as pl
from jax.experimental.pallas import tpu as pltpu


def _norm_mask_kernel(x_ref, mask_ref, gb_ref, o_ref):
    # x_ref:    (Nb, C,  HWt)
    # mask_ref: (Nb, Cm, HWt)   Cm in {1, C}; broadcasts over channels
    # gb_ref:   (2,  C,  1)     row 0 = gamma (scale folded in), row 1 = beta (f32)
    x = x_ref[...]
    m = mask_ref[...]
    gb = gb_ref[...]
    g = gb[0:1]                      # (1, C, 1): broadcast over batch + lanes
    b = gb[1:2]
    o_ref[...] = ((x * g + b) * m).astype(o_ref.dtype)


def _cdiv(a: int, b: int) -> int:
    return -(-a // b)


def _largest_divisor_at_most(n: int, cap: int) -> int:
    cap = max(1, min(int(cap), n))
    for d in range(cap, 0, -1):
        if n % d == 0:
            return d
    return 1


def _num_tensorcores() -> int:
    """Best-effort TensorCore count per chip (2 on v7x, 1 on v5e/v6e)."""
    try:
        d = jax.devices()[0]
        if d.platform != "tpu":
            return 1
        kind = (getattr(d, "device_kind", "") or "").lower()
        if "v7" in kind:
            return 2
        nc = getattr(d, "num_cores", None)
        if isinstance(nc, int) and nc > 0:
            return int(nc)
    except Exception:
        pass
    return 1


def norm_mask(x, mask, gamma, beta, scale=None, *,
              target_block_bytes=6 << 20, vmem_limit_bytes=48 << 20):
    """Pallas TPU implementation of NormMask.forward.

    x:     (N, C, H, W)
    mask:  (N, 1, H, W) or (N, C, H, W)
    gamma: (1, C, 1, 1) or None (None -> x [* scale] + beta)
    beta:  (1, C, 1, 1)
    scale: optional python float, folded into gamma.
    """
    N, C, H, W = x.shape
    HW = H * W
    itemsize = jnp.dtype(x.dtype).itemsize
    mask_itemsize = jnp.dtype(mask.dtype).itemsize

    # Per-channel params in f32; compute promotes, store casts back.
    if gamma is None:
        g = jnp.ones((1, C, 1), jnp.float32)
    else:
        g = jnp.asarray(gamma).reshape(1, C, 1).astype(jnp.float32)
    if scale is not None:
        g = g * jnp.float32(scale)
    b = jnp.asarray(beta).reshape(1, C, 1).astype(jnp.float32)
    gb = jnp.concatenate([g, b], axis=0)                  # (2, C, 1), resident

    x3 = x.reshape(N, C, HW)                              # lane-dense last dim
    Cm = mask.shape[1]
    m3 = mask.reshape(N, Cm, HW)

    ncores = _num_tensorcores()

    # ---- Phase 1: byte-bounded blocks (no padding anywhere).
    #      Full-C / full-HW block dims are legal even when not (8,128)-aligned;
    #      any HW *tile* is a multiple of 128 so dense blocks stay unmasked.
    row_bytes = C * HW * itemsize
    if row_bytes <= target_block_bytes:
        Nb = _largest_divisor_at_most(N, target_block_bytes // row_bytes)
        hw_tile = HW
    else:
        Nb = 1
        if HW > 128:
            hw_tile = max(128, (target_block_bytes // (C * itemsize)) // 128 * 128)
        else:
            hw_tile = HW
    grid_n = N // Nb
    grid_hw = _cdiv(HW, hw_tile)

    # ---- Phase 2: megacore only (v7x): want >= 2 steps per TensorCore so each
    #      core shards work and still double-buffers. Split batch first
    #      (dense divisor blocks), then HW (128-multiple tiles). Skip for tiny
    #      problems where shredding blocks would just add per-step overhead.
    if ncores >= 2:
        min_steps = 2 * ncores
        min_block_bytes = 512 << 10
        while grid_n * grid_hw < min_steps:
            if Nb * C * hw_tile * itemsize <= min_block_bytes:
                break
            if Nb > 1:
                Nb = _largest_divisor_at_most(N, Nb - 1)
                grid_n = N // Nb
            elif hw_tile > 128:
                new_tile = max(128, _cdiv(hw_tile // 2, 128) * 128)
                if new_tile >= hw_tile:
                    break
                hw_tile = new_tile
                grid_hw = _cdiv(HW, hw_tile)
            else:
                break

    cost = pl.CostEstimate(
        flops=3 * N * C * HW,
        transcendentals=0,
        bytes_accessed=(2 * N * C * HW) * itemsize        # x read + out write
        + (N * Cm * HW) * mask_itemsize                   # mask read
        + 2 * C * 4,                                      # gamma/beta
    )

    out = pl.pallas_call(
        _norm_mask_kernel,
        out_shape=jax.ShapeDtypeStruct((N, C, HW), x.dtype),
        grid_spec=pl.GridSpec(
            grid=(grid_n, grid_hw),
            in_specs=[
                pl.BlockSpec((Nb, C, hw_tile), lambda n, h: (n, 0, h)),    # x
                pl.BlockSpec((Nb, Cm, hw_tile), lambda n, h: (n, 0, h)),   # mask
                pl.BlockSpec((2, C, 1), lambda n, h: (0, 0, 0)),           # gamma/beta
            ],
            out_specs=pl.BlockSpec((Nb, C, hw_tile), lambda n, h: (n, 0, h)),
        ),
        compiler_params=pltpu.CompilerParams(
            dimension_semantics=("parallel", "parallel"),
            vmem_limit_bytes=vmem_limit_bytes,
        ),
        cost_estimate=cost,
    )(x3, m3, gb)

    return out.reshape(N, C, H, W)


if __name__ == "__main__":
    key = jax.random.PRNGKey(0)
    kx, km = jax.random.split(key)

    # Small shapes consistent with the module: N=2, C=4, H=W=16
    N, C, H, W = 2, 4, 16, 16
    x = jax.random.normal(kx, (N, C, H, W), dtype=jnp.float32)
    mask = (jax.random.uniform(km, (N, 1, H, W)) > 0.2).astype(jnp.float32)

    # Deterministic parameter init matching NormMask.__init__:
    beta = jnp.zeros((1, C, 1, 1), dtype=jnp.float32)
    gamma = jnp.ones((1, C, 1, 1), dtype=jnp.float32)

    # No-scale path (default forward)
    out = jax.block_until_ready(norm_mask(x, mask, gamma, beta, scale=None))
    ref = (x * gamma + beta) * mask
    assert out.shape == (N, C, H, W)
    assert jnp.allclose(out, ref, atol=1e-6, rtol=1e-6)

    # Scale path (set_scale(0.5)): (x * (gamma*scale) + beta) * mask
    out_s = jax.block_until_ready(norm_mask(x, mask, gamma, beta, scale=0.5))
    ref_s = (x * (gamma * 0.5) + beta) * mask
    assert jnp.allclose(out_s, ref_s, atol=1e-6, rtol=1e-6)

    # Ragged-lane case (19x19 board, HW=361 not a multiple of 128): exercises
    # the no-pad full-HW block path.
    Hb = Wb = 19
    xb = jax.random.normal(kx, (N, C, Hb, Wb), dtype=jnp.float32)
    mb = (jax.random.uniform(km, (N, 1, Hb, Wb)) > 0.2).astype(jnp.float32)
    out_b = jax.block_until_ready(norm_mask(xb, mb, gamma, beta, scale=None))
    ref_b = (xb * gamma + beta) * mb
    assert jnp.allclose(out_b, ref_b, atol=1e-6, rtol=1e-6)

    print("KERNEL_OK")
</pallas_src>

<mosaic_0001>
module attributes {stable_mosaic.version = 11 : i64} {
  func.func @_norm_mask_kernel(%arg0: i32, %arg1: i32, %arg2: memref<2x4x256xf32, #tpu.memory_space<vmem>>, %arg3: memref<2x1x256xf32, #tpu.memory_space<vmem>>, %arg4: memref<2x4x1xf32, #tpu.memory_space<vmem>>, %arg5: memref<2x4x256xf32, #tpu.memory_space<vmem>>) attributes {dimension_semantics = [#tpu.dimension_semantics<parallel>, #tpu.dimension_semantics<parallel>], iteration_bounds = array<i64: 1, 1>, scalar_prefetch = 0 : i64, scratch_operands = 0 : i64, tpu.core_type = #tpu.core_type<tc>, window_params = [{transform_indices = @transform_0, window_bounds = array<i64: 2, 4, 256>}, {transform_indices = @transform_1, window_bounds = array<i64: 2, 1, 256>}, {pipeline_mode = #tpu.pipeline_mode<synchronous>, transform_indices = @transform_2, window_bounds = array<i64: 2, 4, 1>}, {transform_indices = @transform_3, window_bounds = array<i64: 2, 4, 256>}]} {
    %c0 = arith.constant 0 : index
    %c0_0 = arith.constant 0 : index
    %c0_1 = arith.constant 0 : index
    %0 = vector.load %arg2[%c0, %c0_0, %c0_1] : memref<2x4x256xf32, #tpu.memory_space<vmem>>, vector<2x4x256xf32>
    %c0_2 = arith.constant 0 : index
    %c0_3 = arith.constant 0 : index
    %c0_4 = arith.constant 0 : index
    %1 = vector.load %arg3[%c0_2, %c0_3, %c0_4] : memref<2x1x256xf32, #tpu.memory_space<vmem>>, vector<2x1x256xf32>
    %c0_5 = arith.constant 0 : index
    %c0_6 = arith.constant 0 : index
    %c0_7 = arith.constant 0 : index
    %2 = vector.load %arg4[%c0_5, %c0_6, %c0_7] : memref<2x4x1xf32, #tpu.memory_space<vmem>>, vector<2x4x1xf32>
    %3 = vector.extract_strided_slice %2 {offsets = [0, 0, 0], sizes = [1, 4, 1], strides = [1, 1, 1]} : vector<2x4x1xf32> to vector<1x4x1xf32>
    %4 = vector.extract_strided_slice %2 {offsets = [1, 0, 0], sizes = [1, 4, 1], strides = [1, 1, 1]} : vector<2x4x1xf32> to vector<1x4x1xf32>
    %5 = vector.broadcast %3 : vector<1x4x1xf32> to vector<2x4x256xf32>
    %6 = arith.mulf %0, %5 : vector<2x4x256xf32>
    %7 = vector.broadcast %4 : vector<1x4x1xf32> to vector<2x4x256xf32>
    %8 = arith.addf %6, %7 : vector<2x4x256xf32>
    %9 = vector.broadcast %1 : vector<2x1x256xf32> to vector<2x4x256xf32>
    %10 = arith.mulf %8, %9 : vector<2x4x256xf32>
    %c0_8 = arith.constant 0 : index
    %c0_9 = arith.constant 0 : index
    %c0_10 = arith.constant 0 : index
    %11 = vector.load %arg5[%c0_8, %c0_9, %c0_10] : memref<2x4x256xf32, #tpu.memory_space<vmem>>, vector<2x4x256xf32>
    tpu.vector_store %arg5[%c0_8, %c0_9, %c0_10], %10 {strides = array<i32>} : memref<2x4x256xf32, #tpu.memory_space<vmem>>, vector<2x4x256xf32>,
    return
  }
  func.func @transform_0(%arg0: i32, %arg1: i32) -> (i32, i32, i32) {
    %c0_i32 = arith.constant 0 : i32
    %c0_i32_0 = arith.constant 0 : i32
    return %arg0, %c0_i32, %arg1 : i32, i32, i32
  }
  func.func @transform_1(%arg0: i32, %arg1: i32) -> (i32, i32, i32) {
    %c0_i32 = arith.constant 0 : i32
    %c0_i32_0 = arith.constant 0 : i32
    return %arg0, %c0_i32, %arg1 : i32, i32, i32
  }
  func.func @transform_2(%arg0: i32, %arg1: i32) -> (i32, i32, i32) {
    %c0_i32 = arith.constant 0 : i32
    %c0_i32_0 = arith.constant 0 : i32
    %c0_i32_1 = arith.constant 0 : i32
    %c0_i32_2 = arith.constant 0 : i32
    return %c0_i32, %c0_i32_0, %c0_i32_1 : i32, i32, i32
  }
  func.func @transform_3(%arg0: i32, %arg1: i32) -> (i32, i32, i32) {
    %c0_i32 = arith.constant 0 : i32
    %c0_i32_0 = arith.constant 0 : i32
    return %arg0, %c0_i32, %arg1 : i32, i32, i32
  }
}

</mosaic_0001>

<bundles_post_ra>
// kernel: tpu_custom_call.1
= control target key start
LH: loop header
LB: loop body
LE: loop exit
PB: predicated region body
PF: predicated region fallthrough
CT: control target
= control target key end

     0   :  { %8 = vsyncpa [#allocation3], 0  ;;  %s229_s0 = inlined_call_operand.hbm [shape: f32[2,4,256], index: 0, kind: input, shape index: {}]   ;;  %s230_s1 = inlined_call_operand.vmem [shape: f32[2,1,256], index: 1, kind: input, shape index: {}]   ;;  %s231_s2 = inlined_call_operand.vmem [shape: f32[2,4,1], index: 2, kind: input, shape index: {}]   ;;  %s232_s3 = inlined_call_operand.hbm [shape: f32[2,4,256], index: 3, kind: output, shape index: {}]  }
   0x1   :  { %9 = vsyncpa [#allocation4], 0  ;;  %s161_s12 = smov [#allocation2]   ;;  %s113_s16 = scalar_lea.hbm %s229_s0, 256 }
   0x2   :  { %s15_s13 = sshll.u32 %s161_s12, 4  ;;  %p114_p0 = scmp.ne.s32.totalorder %s229_s0, %s113_s16  ;;  %s16_s13 = int_to_ptr.vmem [resolvable:$true] %s15_s13 }
   0x3   :  { %p117_p1 = scmp.lt.u32.totalorder %s113_s16, %s229_s0 }
   0x5   :  { %p119_p2 = pnand %p117_p1, %p114_p0 }
   0x7   :  { %122 = shalt.err (!%p119_p2)
}
   0x8   :  { %s123_s21 = scalar_lea.vmem %s16_s13, 256  ;;  %p128_p4 = scmp.lt.s32.totalorder %s16_s13, %s16_s13 }
   0x9   :  { %p124_p3 = scmp.ne.s32.totalorder %s16_s13, %s123_s21  ;;  %p129_p5 = scmp.lt.s32.totalorder %s123_s21, %s123_s21 }
   0xb   :  { %p130_p6 = por %p129_p5, %p128_p4 }
   0xd   :  { %p131_p7 = pnand %p130_p6, %p124_p3 }
   0xf   :  { %134 = shalt.err (!%p131_p7)
}
  0x10   :  { %s162_s22 = smov 128   ;;  %s163_s23 = smov 8  }
  0x11   :  { %21 = dma.hbm_to_vmem [thread:$0]  %s229_s0, 256, %s16_s13, [#allocation3], %s162_s22, %s162_s22, %s163_s23  }
  0x12   :  { %157 = dma.done.wait [#allocation3], 256  }
  0x13   :  { %158 = vsyncadd [#allocation3], 4294967040  ;;  %v164_v0 = vmov 0   ;;  %v33_v1 = vld [vmem:[%s231_s2] sm:$0xf]  ;;  %v42_v5 = vlaneseq  ;;  %v30_v20 = vld [vmem:[#allocation2 + $0x8] sm:$0xff] }
  0x14   :  { %112 = vset.pattern.permute.xlu0 %v164_v0  ;;  %v34_v2 = vld [vmem:[%s231_s2 + $0x4] sm:$0xf]  ;;  %v165_v3 = vmov 839922192   ;;  %v31_v11 = vld [vmem:[%s230_s1] sm:$0x3] }
  0x15   :  { %37 = vperm.xlu0 %112, %v33_v1   ;;  %v40_v4 = vunpack.c.l.s4 %v165_v3  ;;  %v43_v7 = vshrl.u32 %v42_v5, 7  ;;  %v32_v12 = vld [vmem:[%s230_s1 + $0x2] sm:$0x3]  ;;  %s166_s2 = smov [#allocation5]  }
  0x16   :  { %v29_v19 = vld [vmem:[#allocation2] sm:$0xff]  ;;  %s94_s6 = sshll.u32 %s166_s2, 4  ;;  %s95_s6 = int_to_ptr.vmem [resolvable:$true] %s94_s6 }
  0x17   :  { %v41_v6 = vunpack.c.0.s8 %v40_v4  ;;  %v67_v8 = vsub.s32 0, %v43_v7  ;;  %v71_v9 = vsub.s32 1, %v43_v7  ;;  %s135_s1 = scalar_lea.vmem %s95_s6, 256  ;;  %p140_p9 = scmp.lt.s32.totalorder %s95_s6, %s95_s6 }
  0x18   :  { %p136_p8 = scmp.ne.s32.totalorder %s95_s6, %s135_s1  ;;  %p141_p10 = scmp.lt.s32.totalorder %s135_s1, %s135_s1 }
  0x19   :  { %51 = vperm.xlu0 %112, %v34_v2   ;;  %v44_v10 = vsub.s32 %v41_v6, %v43_v7  ;;  %v68_v14 = vrot.slane %v31_v11, %v67_v8  ;;  %v72_v15 = vrot.slane %v31_v11, %v71_v9  ;;  %v76_v17 = vrot.slane %v32_v12, %v67_v8 }
  0x1a   :  { %v80_v18 = vrot.slane %v32_v12, %v71_v9  ;;  %p142_p11 = por %p141_p10, %p140_p9 }
  0x1b   :  { %v81_v22 = vcombine.low %v68_v14, %v72_v15 }
  0x1c   :  { %v82_v26 = vcombine.low %v76_v17, %v80_v18  ;;  %p143_p12 = pnand %p142_p11, %p136_p8 }
  0x94   :  { %v38_v13 = vpop.permute.xlu0 %37 }
  0x95   :  { %v45_v16 = vrot.slane %v38_v13, %v44_v10 }
  0x97   :  { %v47_v23 = vmul.f32 %v45_v16, %v29_v19  ;;  %v48_v24 = vmul.f32 %v45_v16, %v30_v20 }
  0x98   :  { %v52_v21 = vpop.permute.xlu0 %51 }
  0x99   :  { %v59_v25 = vrot.slane %v52_v21, %v44_v10 }
  0x9b   :  { %v61_v27 = vadd.f32 %v59_v25, %v47_v23  ;;  %v62_v28 = vadd.f32 %v59_v25, %v48_v24 }
  0x9d   :  { %v85_v29 = vmul.f32 %v81_v22, %v61_v27  ;;  %v86_v30 = vmul.f32 %v82_v26, %v62_v28 }
  0x9f   :  { %87 = vst [vmem:[#allocation5] sm:$0xff] %v85_v29  ;;  %88 = vst [vmem:[#allocation5 + $0x8] sm:$0xff] %v86_v30 }
  0xa0   :  { %146 = shalt.err (!%p143_p12)
}
  0xa1   :  { %s147_s9 = scalar_lea.hbm %s232_s3, 256 }
  0xa2   :  { %p148_p13 = scmp.ne.s32.totalorder %s232_s3, %s147_s9  ;;  %p151_p0 = scmp.lt.u32.totalorder %s147_s9, %s232_s3 }
  0xa4   :  { %p153_p1 = pnand %p151_p0, %p148_p13 }
  0xa6   :  { %156 = shalt.err (!%p153_p1)
}
  0xa7   :  { %100 = dma.vmem_to_hbm [thread:$0]  %s95_s6, 256, %s232_s3, [#allocation4], %s162_s22, %s162_s22, %s163_s23  }
  0xa8   :  { %159 = dma.done.wait [#allocation4], 256  }
  0xa9   :  { %160 = vsyncadd [#allocation4], 4294967040 }
  0xaa   :  { %104 = vsyncpa [#allocation3], 1 }
  0xab   :  { %105 = vsyncpa [#allocation4], 1 }

</bundles_post_ra>
